<compile_context>
chip_gen: v7x
topology: tpu7x:2x2x1
jax: 0.10.0
libtpu: 0.0.40
codegen_flags: <defaults>
</compile_context>

<pallas_src>
import functools

import jax
import jax.numpy as jnp
from jax import lax
from jax.experimental import pallas as pl
from jax.experimental.pallas import tpu as pltpu


# ----------------------------------------------------------------------------
# Kernel bodies
# ----------------------------------------------------------------------------

def _softmax_neg(gram_f32, out_dtype):
    """softmax(rowmax(G) - G) == softmax(-G); stable exponent is rowmin(G) - G."""
    e = jnp.exp(jnp.min(gram_f32, axis=-1, keepdims=True) - gram_f32)
    denom = jnp.sum(e, axis=-1, keepdims=True)
    # Exact reciprocal still issues on the EUP slot (same cost as approx=True),
    # without the ~1e-3 relative error the approximate one introduces.
    return (e * pl.reciprocal(denom, approx=False)).astype(out_dtype)


def _cam_fused_kernel(x_ref, o_ref, *, att_dtype):
    # Single pass: the whole (C, HWp) slab is VMEM-resident, x is read once.
    a = x_ref[...]                                           # (C, HWp), x dtype
    gram = lax.dot_general(                                  # (C, C) f32, contract HW
        a, a, dimension_numbers=(((1,), (1,)), ((), ())),
        preferred_element_type=jnp.float32)
    att = _softmax_neg(gram, att_dtype)
    a_mm = a if a.dtype == att.dtype else a.astype(att.dtype)
    feat = jnp.dot(att, a_mm, preferred_element_type=jnp.float32)
    o_ref[...] = (feat + a).astype(o_ref.dtype)              # residual add in f32


def _cam_two_pass_kernel(x_ref, o_ref, gram_ref, att_ref):
    # Blocks: x_ref / o_ref are (C, hw_tile) (batch dim squeezed).
    # gram_ref: (C, C) f32 accumulator; att_ref: (C, C) attention weights.
    phase = pl.program_id(1)
    t = pl.program_id(2)

    @pl.when(jnp.logical_and(phase == 0, t == 0))
    def _init():
        gram_ref[...] = jnp.zeros_like(gram_ref)

    @pl.when(phase == 0)
    def _accumulate_gram():
        a = x_ref[...]
        # Contract the HW axis of both operands directly (no transposed copy).
        gram_ref[...] += lax.dot_general(
            a, a, dimension_numbers=(((1,), (1,)), ((), ())),
            preferred_element_type=jnp.float32)

    @pl.when(jnp.logical_and(phase == 1, t == 0))
    def _softmax():
        att_ref[...] = _softmax_neg(gram_ref[...], att_ref.dtype)

    @pl.when(phase == 1)
    def _project():
        a = x_ref[...]
        a_mm = a if a.dtype == att_ref.dtype else a.astype(att_ref.dtype)
        feat = jnp.dot(att_ref[...], a_mm, preferred_element_type=jnp.float32)
        o_ref[...] = (feat + a).astype(o_ref.dtype)


# ----------------------------------------------------------------------------
# Wrapper
# ----------------------------------------------------------------------------

def _round_up(x, m):
    return ((x + m - 1) // m) * m


def _vmem_capacity_bytes():
    try:
        return int(pltpu.get_tpu_info().vmem_capacity_bytes)
    except Exception:
        return 64 * 1024 * 1024           # conservative (v7x per-core VMEM)


def _vmem_limit(footprint_bytes, vmem_cap):
    want = int(1.5 * footprint_bytes) + (8 << 20)
    return int(max(32 << 20, min(want, int(0.9 * vmem_cap), 128 << 20)))


def channel_attention_module(x, *, hw_tile_target=1024, force_two_pass=False,
                             attention_dtype=None):
    """x: (B, C, H, W) NCHW.  Returns (B, C, H, W).  No learnable parameters.

    attention_dtype: optionally compute the (C, C) softmax weights / projection
    matmul in a narrower dtype (e.g. jnp.bfloat16) to halve the att scratch and
    use the bf16 MXU rate.  Default: same dtype as x (reference precision).
    """
    B, C, H, W = x.shape
    HW = H * W
    itemsize = jnp.dtype(x.dtype).itemsize
    att_dtype = jnp.dtype(attention_dtype) if attention_dtype is not None else jnp.dtype(x.dtype)

    vmem_cap = _vmem_capacity_bytes()
    budget = int(0.45 * vmem_cap)          # headroom for compiler temps / pipelining

    x_flat = x.reshape(B, C, HW)

    # ---------------- fused single-pass path ----------------
    hw_fused = _round_up(max(HW, 128), 128)
    fused_bytes = 4 * C * hw_fused * itemsize + 16 * C * C   # 2x in + 2x out buffers + (C,C) temps
    use_fused = (not force_two_pass) and (fused_bytes <= budget)

    if use_fused:
        HWp = hw_fused
        if HWp != HW:                      # zero padding is exactly neutral here
            x_flat = jnp.pad(x_flat, ((0, 0), (0, 0), (0, HWp - HW)))
        cost = pl.CostEstimate(
            flops=4 * B * C * C * HWp,
            transcendentals=B * C * C,
            bytes_accessed=2 * B * C * HWp * itemsize)
        out_flat = pl.pallas_call(
            functools.partial(_cam_fused_kernel, att_dtype=att_dtype),
            out_shape=jax.ShapeDtypeStruct((B, C, HWp), x.dtype),
            grid_spec=pltpu.PrefetchScalarGridSpec(
                num_scalar_prefetch=0,
                grid=(B,),
                in_specs=[pl.BlockSpec((pl.Squeezed(), C, HWp), lambda b: (b, 0, 0))],
                out_specs=pl.BlockSpec((pl.Squeezed(), C, HWp), lambda b: (b, 0, 0)),
            ),
            compiler_params=pltpu.CompilerParams(
                dimension_semantics=("parallel",),
                vmem_limit_bytes=_vmem_limit(fused_bytes, vmem_cap)),
            cost_estimate=cost,
        )(x_flat)
        return out_flat[:, :, :HW].reshape(B, C, H, W)

    # ---------------- two-pass streaming path ----------------
    # Per-step VMEM: in/out double buffers (4 * C * tile * itemsize) + gram (4*C^2)
    # + att scratch (att_itemsize * C^2).
    fixed_bytes = 4 * C * C + att_dtype.itemsize * C * C
    per_col = 4 * C * itemsize
    max_tile_cols = max((budget - fixed_bytes) // per_col, 128)
    tile = min(hw_tile_target, max_tile_cols, _round_up(HW, 128))
    tile = max((tile // 128) * 128, 128)

    HWp = _round_up(HW, tile)
    if HWp != HW:                          # zero padding is exactly neutral here
        x_flat = jnp.pad(x_flat, ((0, 0), (0, 0), (0, HWp - HW)))
    nt = HWp // tile

    footprint = fixed_bytes + per_col * tile
    cost = pl.CostEstimate(
        flops=4 * B * C * C * HWp,
        transcendentals=B * C * C,
        bytes_accessed=3 * B * C * HWp * itemsize)   # read x twice, write out once

    out_flat = pl.pallas_call(
        _cam_two_pass_kernel,
        out_shape=jax.ShapeDtypeStruct((B, C, HWp), x.dtype),
        grid_spec=pltpu.PrefetchScalarGridSpec(
            num_scalar_prefetch=0,
            grid=(B, 2, nt),               # (batch, phase, hw tiles)
            in_specs=[pl.BlockSpec((pl.Squeezed(), C, tile),
                                   lambda b, p, t: (b, 0, t))],
            # Phase 0 parks the (never-written) output block on tile 0.  Pallas only
            # writes an output block back to HBM when its block index changes; the
            # first change happens after phase-1 t==0 has fully rewritten that block,
            # so no uninitialized VMEM ever reaches HBM.
            out_specs=pl.BlockSpec((pl.Squeezed(), C, tile),
                                   lambda b, p, t: (b, 0, t * p)),
            scratch_shapes=[pltpu.VMEM((C, C), jnp.float32),   # gram accumulator
                            pltpu.VMEM((C, C), att_dtype)],    # softmax weights
        ),
        compiler_params=pltpu.CompilerParams(
            dimension_semantics=("parallel", "arbitrary", "arbitrary"),
            vmem_limit_bytes=_vmem_limit(footprint, vmem_cap)),
        cost_estimate=cost,
    )(x_flat)

    # TODO(synk): megacore (v7x, B==1) split of the phase-1 projection over C-row
    # blocks is not implemented; batch is the only parallel grid axis.
    return out_flat[:, :, :HW].reshape(B, C, H, W)


# ----------------------------------------------------------------------------
# Pure-JAX reference (mirrors the PyTorch forward, f32 math, HIGHEST precision
# so TPU default matmul rounding does not get exponentiated by the softmax).
# ----------------------------------------------------------------------------

def _reference(x):
    B, C, H, W = x.shape
    a = x.reshape(B, C, H * W).astype(jnp.float32)
    att = jnp.einsum('bcn,bdn->bcd', a, a, precision=lax.Precision.HIGHEST)
    att_new = jnp.max(att, axis=-1, keepdims=True) - att
    att_sm = jax.nn.softmax(att_new, axis=-1)
    feat_e = jnp.einsum('bcd,bdn->bcn', att_sm, a,
                        precision=lax.Precision.HIGHEST).reshape(B, C, H, W)
    return feat_e + x.astype(jnp.float32)


if __name__ == "__main__":
    key = jax.random.PRNGKey(0)
    B, C, H, W = 2, 8, 16, 16
    # Modest input scale keeps the gram matrix O(1): the channel softmax is an
    # exponential amplifier, so this makes the comparison robust to harmless
    # accumulation-order differences while still exercising the full data path.
    x = 0.1 * jax.random.normal(key, (B, C, H, W), dtype=jnp.float32)

    ref = _reference(x)

    # Path 1: fused single-pass kernel (slab fits VMEM at these shapes).
    out_fused = jax.block_until_ready(channel_attention_module(x))
    assert out_fused.shape == (B, C, H, W)
    assert jnp.allclose(out_fused, ref, atol=2e-3, rtol=2e-3), "fused path mismatch vs reference"

    # Path 2: two-pass streaming kernel with a small tile so the multi-tile
    # (nt > 1) grid and the gram accumulator are exercised as well.
    out_2p = jax.block_until_ready(
        channel_attention_module(x, hw_tile_target=128, force_two_pass=True))
    assert out_2p.shape == (B, C, H, W)
    assert jnp.allclose(out_2p, ref, atol=2e-3, rtol=2e-3), "two-pass path mismatch vs reference"

    print("KERNEL_OK")
</pallas_src>

<mosaic_0001>
module attributes {stable_mosaic.version = 11 : i64} {
  func.func @_cam_fused_kernel(%arg0: i32, %arg1: memref<1x8x256xf32, #tpu.memory_space<vmem>>, %arg2: memref<1x8x256xf32, #tpu.memory_space<vmem>>) attributes {dimension_semantics = [#tpu.dimension_semantics<parallel>], iteration_bounds = array<i64: 2>, scalar_prefetch = 0 : i64, scratch_operands = 0 : i64, tpu.core_type = #tpu.core_type<tc>, window_params = [{transform_indices = @transform_0, window_bounds = array<i64: 1, 8, 256>}, {transform_indices = @transform_1, window_bounds = array<i64: 1, 8, 256>}]} {
    %c0 = arith.constant 0 : index
    %c0_0 = arith.constant 0 : index
    %c0_1 = arith.constant 0 : index
    %0 = vector.load %arg1[%c0, %c0_0, %c0_1] : memref<1x8x256xf32, #tpu.memory_space<vmem>>, vector<1x8x256xf32>
    %1 = vector.shape_cast %0 : vector<1x8x256xf32> to vector<8x256xf32>
    %cst = arith.constant dense<0.000000e+00> : vector<8x8xf32>
    %2 = tpu.matmul %1, %1, %cst {dimension_numbers = #tpu.dot_dimension_numbers<[1], [1], [0], [0], [0, 0, 1, 0], [], []>} : vector<8x256xf32>, vector<8x256xf32>, vector<8x8xf32> -> vector<8x8xf32>
    %cst_2 = arith.constant dense<0x7F800000> : vector<8xf32>
    %3 = vector.multi_reduction <minimumf>, %2, %cst_2 [1] : vector<8x8xf32> to vector<8xf32>
    %4 = vector.shape_cast %3 : vector<8xf32> to vector<8x1xf32>
    %5 = vector.broadcast %4 : vector<8x1xf32> to vector<8x8xf32>
    %6 = arith.subf %5, %2 : vector<8x8xf32>
    %7 = math.exp %6 : vector<8x8xf32>
    %cst_3 = arith.constant dense<0.000000e+00> : vector<8xf32>
    %8 = vector.multi_reduction <add>, %7, %cst_3 [1] : vector<8x8xf32> to vector<8xf32>
    %9 = vector.shape_cast %8 : vector<8xf32> to vector<8x1xf32>
    %10 = tpu.reciprocal %9 : vector<8x1xf32> -> vector<8x1xf32>
    %11 = vector.broadcast %10 : vector<8x1xf32> to vector<8x8xf32>
    %12 = arith.mulf %7, %11 : vector<8x8xf32>
    %cst_4 = arith.constant dense<0.000000e+00> : vector<8x256xf32>
    %13 = tpu.matmul %12, %1, %cst_4 {dimension_numbers = #tpu.dot_dimension_numbers<[1], [0], [0], [1], [0, 0, 1, 1], [], []>} : vector<8x8xf32>, vector<8x256xf32>, vector<8x256xf32> -> vector<8x256xf32>
    %14 = arith.addf %13, %1 : vector<8x256xf32>
    %c0_5 = arith.constant 0 : index
    %c0_6 = arith.constant 0 : index
    %c0_7 = arith.constant 0 : index
    %15 = vector.load %arg2[%c0_5, %c0_6, %c0_7] : memref<1x8x256xf32, #tpu.memory_space<vmem>>, vector<1x8x256xf32>
    %16 = vector.shape_cast %15 : vector<1x8x256xf32> to vector<8x256xf32>
    %17 = vector.shape_cast %14 : vector<8x256xf32> to vector<1x8x256xf32>
    tpu.vector_store %arg2[%c0_5, %c0_6, %c0_7], %17 {strides = array<i32>} : memref<1x8x256xf32, #tpu.memory_space<vmem>>, vector<1x8x256xf32>,
    return
  }
  func.func @transform_0(%arg0: i32) -> (i32, i32, i32) {
    %c0_i32 = arith.constant 0 : i32
    %c0_i32_0 = arith.constant 0 : i32
    %c0_i32_1 = arith.constant 0 : i32
    return %arg0, %c0_i32, %c0_i32_0 : i32, i32, i32
  }
  func.func @transform_1(%arg0: i32) -> (i32, i32, i32) {
    %c0_i32 = arith.constant 0 : i32
    %c0_i32_0 = arith.constant 0 : i32
    %c0_i32_1 = arith.constant 0 : i32
    return %arg0, %c0_i32, %c0_i32_0 : i32, i32, i32
  }
}

</mosaic_0001>

<bundles_post_ra>
// kernel: tpu_custom_call.1
= control target key start
LH: loop header
LB: loop body
LE: loop exit
PB: predicated region body
PF: predicated region fallthrough
CT: control target
= control target key end

     0   :  { %6 = vsyncpa [#allocation3], 0  ;;  %s725_s0 = inlined_call_operand.hbm [shape: f32[2,8,256], index: 0, kind: input, shape index: {}]   ;;  %s726_s1 = inlined_call_operand.hbm [shape: f32[2,8,256], index: 1, kind: output, shape index: {}]  }
   0x1   :  { %8 = vsyncpa [#allocation3 + $0x1], 0 }
   0x2   :  { %9 = vsyncpa [#allocation4], 0 }
   0x3   :  { %11 = vsyncpa [#allocation4 + $0x1], 0  ;;  %s557_s6 = smov 0   ;;  %s559_s7 = smov 0  }
   0x4   :  { %s561_s8 = smov 0   ;;  %s563_s9 = smov 0  }
   0x5 LB: > { %s578_s10 = sadd.s32 4294967295, %s542_s9   ;;  %s378_s11 = sadd.s32 4294967294, %s542_s9   ;;  %s542_s9 = sphi %s563_s9, %s741_s9   ;;  %s538_s8 = sphi %s561_s8, %s740_s8   ;;  %s534_s7 = sphi %s559_s7, %s739_s7   ;;  %s530_s6 = sphi %s557_s6, %s738_s6  }
   0x6   : > { %s582_s12 = sadd.s32 1, %s542_s9   ;;  %s24_s13 = sadd.s32 1, %s538_s8 }
   0x7   : > { %s21_s14 = ssub.s32 %s542_s9, %s582_s12  ;;  %p31_p0 = scmp.ne.s32.totalorder %s538_s8, %s534_s7 }
   0x8   : > { %p22_p1 = scmp.eq.s32.totalorder %s21_s14, 0  ;;  %p32_p2 = scmp.eq.s32.totalorder %s542_s9, 0 }
   0x9   : > { %p37_p3 = scmp.ne.s32.totalorder %s534_s7, %s530_s6  ;;  %p38_p4 = scmp.eq.s32.totalorder %s578_s10, 0 }
   0xa   : > { %s594_s15 = scalar_select %p22_p1, %s538_s8, %s24_s13  }
   0xb   : > { %p596_p5 = por %p32_p2, %p31_p0  ;;  %p600_p6 = por %p38_p4, %p37_p3 }
   0xc   : > { %p61_p7 = scmp.eq.s32.totalorder %s578_s10, 1  ;;  %p67_p8 = scmp.eq.s32.totalorder %s378_s11, 1 }
   0xd   : > { %p407_p10 = scmp.lt.s32.totalorder %s542_s9, 2  ;;  %s87_s20 = sand.u32 1, %s538_s8  }
   0xe   : > { %p607_p11 = por %p61_p7, %p31_p0  ;;  %p611_p12 = por %p67_p8, %p37_p3 }
   0xf   : > { %s393_s21 = sshll.u32 %s542_s9, 8  ;;  %s381_s22 = sshll.u32 %s87_s20, 4 }
  0x10   : > { %s730_s18 = scalar_select %p607_p11, 1, 0 }
  0x11   : > { %s731_s19 = scalar_select %p611_p12, 1, 0 }
  0x12   : > { %s620_s25 = scalar_lea.hbm %s725_s0, %s393_s21  ;;  %s91_s26 = scalar_lea.vmem [#allocation2], %s381_s22 }
  0x13   : > { %s99_s27 = sshll.u32 %s91_s26, 4  ;;  %p624_p13 = pnand %p407_p10, %p596_p5  ;;  %s628_s27 = int_to_ptr.vmem [resolvable:$true] %s99_s27 }
  0x14   : > { %s88_s29 = scalar_lea.sflag [#allocation3], %s87_s20  ;;  %s446_s30 = scalar_lea.hbm %s620_s25, 256 }
  0x15   : > { %p447_p2 = scmp.ne.s32.totalorder %s620_s25, %s446_s30  ;;  %p448_p3 = pneg %p624_p13 }
  0x16   : > { %s451_s4 = scalar_lea.hbm %s725_s0, 512  ;;  %p452_p5 = scmp.lt.u32.totalorder %s620_s25, %s725_s0 }
  0x17   : > { %p449_p4 = pnand %p448_p3, %p447_p2  ;;  %p453_p8 = scmp.lt.u32.totalorder %s451_s4, %s446_s30 }
  0x18   : > { %p455_p9 = scmp.lt.u32.totalorder %s446_s30, %s620_s25 }
  0x19   : > { %p450_p7 = pneg %p449_p4  ;;  %p454_p10 = por %p453_p8, %p452_p5 }
  0x1b   : > { %p456_p0 = por %p455_p9, %p454_p10 }
  0x1d   : > { %p457_p1 = pnand %p456_p0, %p450_p7 }
  0x1f   : > { %460 = shalt.err (!%p457_p1)
}
  0x20   : > { %s461_s13 = scalar_lea.vmem %s628_s27, 256  ;;  %s544_s14 = smov [#allocation2]  }
  0x21   : > { %p462_p2 = scmp.ne.s32.totalorder %s628_s27, %s461_s13  ;;  %s466_s16 = sshll.u32 %s544_s14, 4  ;;  %s467_s16 = int_to_ptr.vmem [resolvable:$false] %s466_s16 }
  0x22   : > { %s468_s20 = scalar_lea.vmem %s467_s16, 512  ;;  %p469_p11 = scmp.lt.s32.totalorder %s628_s27, %s467_s16 }
  0x23   : > { %p464_p4 = pnand %p462_p2, %p448_p3  ;;  %p470_p5 = scmp.lt.s32.totalorder %s468_s20, %s461_s13 }
  0x25   : > { %p465_p12 = pneg %p464_p4  ;;  %p471_p8 = por %p470_p5, %p469_p11 }
  0x27   : > { %p472_p9 = pnand %p471_p8, %p465_p12 }
  0x29   : > { %475 = shalt.err (!%p472_p9)
}
  0x2a   : > { %402 = dma.hbm_to_vmem [thread:$0]  (!%p624_p13), %s620_s25, 256, %s628_s27, %s88_s29  }
  0x2b   : > { %p733_p0 = scmp.lt.s32.totalorder %s542_s9, 3  ;;  %p734_p1 = scmp.ge.s32.totalorder %s542_s9, 1 }
  0x2d   : > { %p105_p3 = pnand %p734_p1, %p733_p0 }
  0x2e   : > { %s662_s21 = sand.u32 (!%p105_p3), 1, %s534_s7  }
  0x2f   : > { %108 = sbr.rel (%p105_p3) target bundleno = 815 (0x32f), region = 24  ;;  %s385_s22 = sshll.u32 (!%p105_p3), %s662_s21, 4 }
  0x30   : > { %s111_s23 = scalar_lea.sflag (!%p105_p3), [#allocation3], %s662_s21  ;;  %s114_s24 = scalar_lea.vmem (!%p105_p3), [#allocation2], %s385_s22 }
  0x36   : > { %521 = dma.done.wait (%p600_p6), %s111_s23, 256  }
  0x37   : > { %523 = vsyncadd (%p600_p6), %s111_s23, 4294967040  ;;  %v134_v0 = vld [vmem:[%s114_s24 + $0x8] sm:$0xff]  ;;  %v133_v1 = vld [vmem:[%s114_s24] sm:$0xff]  ;;  %vm205_vm0 = vcmask 64512   ;;  %v545_v10 = vmov 0.0   ;;  %s394_s17 = sshll.u32 %s578_s10, 8 }
  0x38   : > { %135 = vmatprep.subr.mxu0 %v134_v0  ;;  %199 = vmatprep.mubr.f32.mxu0 %v134_v0  ;;  %s132_s25 = scalar_lea.vmem [#allocation5], %s385_s22  ;;  %s681_s29 = scalar_lea.hbm %s726_s1, %s394_s17 }
  0x39   : > { %136 = vmatpush1.xpose.msra.mxu0 %v133_v1  ;;  %220 = vmatprep.subr.mxu1 %v134_v0  ;;  %s308_s26 = sshll.u32 %s132_s25, 4  ;;  %s294_s10 = scalar_lea.sflag [#allocation4], %s662_s21  ;;  %s683_s26 = int_to_ptr.vmem [resolvable:$true] %s308_s26 }
  0x3a   : > { %221 = vmatpush1.msra.mxu1 %v133_v1  ;;  %284 = vmatprep.mubr.f32.mxu1 %v545_v10  ;;  %s476_s30 = scalar_lea.vmem %s683_s26, 256  ;;  %p735_p11 = scmp.ne.s32.totalorder %s730_s18, 0 }
  0x3b   : > { %p477_p6 = scmp.ne.s32.totalorder %s683_s26, %s476_s30  ;;  %s546_s2 = smov [#allocation5]  }
  0x3c   : > { %200 = vmatmul.mubr.f32.vlgmr.msra.gmra.mrb[0].mxu0 %v133_v1  ;;  %s480_s3 = sshll.u32 %s546_s2, 4  ;;  %s481_s3 = int_to_ptr.vmem [resolvable:$false] %s480_s3 }
  0x3d   : > { %p478_p12 = pnand %p477_p6, %p735_p11  ;;  %s482_s4 = scalar_lea.vmem %s481_s3, 512 }
  0x3e   : > { %p483_p7 = scmp.lt.s32.totalorder %s683_s26, %s481_s3  ;;  %p484_p10 = scmp.lt.s32.totalorder %s482_s4, %s476_s30 }
  0x3f   : > { %p479_p13 = pneg %p478_p12 }
  0x40   : > { %p485_p2 = por %p484_p10, %p483_p7 }
  0x42   : > { %p486_p4 = pnand %p485_p2, %p479_p13 }
 0x10f   : > { %v201_v2 = vpop.f32.mrb[0].mxu0 }
 0x110   : > { %v203_v3 = vpop.f32.mrb[1].mxu0  ;;  %v206_v4 = vsel %vm205_vm0, %v201_v2, inf }
 0x111   : > { %207 = vmin.xlane.f32.xlu0 %v206_v4 }
 0x19e   : > { %v208_v5 = vpop.xlane.xlu0 %207 }
 0x19f   : > { %v209_v6 = vsub.f32 %v208_v5, %v201_v2 }
 0x1a1   : > { %v210_v7 = vmul.f32 1.442695, %v209_v6 }
 0x1a3   : > { %442 = vpow2.f32 %v210_v7 }
 0x1ad   : > { %v443_v8 = vpop.eup %442 }
 0x1ae   : > { %v212_v9 = vsel %vm205_vm0, %v443_v8, 0.0 }
 0x1af   : > { %213 = vadd.xlane.f32.xlu0 %v212_v9 }
 0x23c   : > { %v214_v11 = vpop.xlane.xlu0 %213 }
 0x23d   : > { %444 = vrcp.f32 %v214_v11 }
 0x247   : > { %v445_v12 = vpop.eup %444 }
 0x248   : > { %v216_v13 = vmul.f32 %v445_v12, %v443_v8 }
 0x24a   : > { %387 = vmatmul.mubr.msk.f32.vlgmr.msra.gmra.mrb[0].mxu1 %vm205_vm0, %v216_v13 }
 0x31d   : > { %v286_v14 = vpop.f32.mrb[0].mxu1 }
 0x31e   : > { %v287_v15 = vadd.f32 %v286_v14, %v133_v1  ;;  %v288_v16 = vpop.f32.mrb[1].mxu1 }
 0x31f   : > { %v289_v17 = vadd.f32 %v288_v16, %v134_v0 }
 0x320   : > { %291 = vst [vmem:[%s132_s25] sm:$0xff] %v287_v15 }
 0x321   : > { %292 = vst [vmem:[%s132_s25 + $0x8] sm:$0xff] %v289_v17 }
 0x322   : > { %489 = shalt.err (!%p486_p4)
}
 0x323   : > { %s490_s5 = scalar_lea.hbm %s681_s29, 256  ;;  %s494_s14 = scalar_lea.hbm %s726_s1, 512 }
 0x324   : > { %p491_p5 = scmp.ne.s32.totalorder %s681_s29, %s490_s5  ;;  %p495_p0 = scmp.lt.u32.totalorder %s681_s29, %s726_s1 }
 0x325   : > { %p496_p1 = scmp.lt.u32.totalorder %s494_s14, %s490_s5  ;;  %p498_p6 = scmp.lt.u32.totalorder %s490_s5, %s681_s29 }
 0x326   : > { %p492_p8 = pnand %p491_p5, %p735_p11 }
 0x327   : > { %p497_p3 = por %p496_p1, %p495_p0 }
 0x328   : > { %p493_p9 = pneg %p492_p8 }
 0x329   : > { %p499_p12 = por %p498_p6, %p497_p3 }
 0x32b   : > { %p500_p13 = pnand %p499_p12, %p493_p9 }
 0x32d   : > { %503 = shalt.err (!%p500_p13)
}
 0x32e   : > { %397 = dma.vmem_to_hbm [thread:$0]  (%p735_p11), %s683_s26, 256, %s681_s29, %s294_s10  }
 0x32f PF: > { %s320_s21 = sand.u32 1, %s530_s6   ;;  %p736_p7 = scmp.ne.s32.totalorder %s731_s19, 0 }
 0x330   : > { %p737_p10 = scmp.ge.s32.totalorder %s542_s9, 2  ;;  %s321_s22 = scalar_lea.sflag [#allocation4], %s320_s21 }
 0x332   : > { %p404_p2 = pnand %p737_p10, %p736_p7 }
 0x334   : > { %525 = dma.done.wait (!%p404_p2), %s321_s22, 256  }
 0x335   : > { %527 = vsyncadd (!%p404_p2), %s321_s22, 4294967040  ;;  %p14_p4 = scmp.ge.s32.totalorder %s582_s12, 4   ;;  %s738_s6 = smov %s534_s7 }
 0x336   : > { %s739_s7 = smov %s538_s8  ;;  %s740_s8 = smov %s594_s15 }
 0x337   : > { %s741_s9 = smov %s582_s12  ;;  %16 = sbr.rel (!%p14_p4) target bundleno = 5 (0x5), region = 69 }
 0x33e   :  { %326 = vsyncpa [#allocation3], 1 }
 0x33f   :  { %328 = vsyncpa [#allocation3 + $0x1], 1 }
 0x340   :  { %329 = vsyncpa [#allocation4], 1 }
 0x341   :  { %331 = vsyncpa [#allocation4 + $0x1], 1 }

</bundles_post_ra>
